<compile_context>
chip_gen: v5e
topology: v5e:2x2
jax: 0.10.0
libtpu: 0.0.40
codegen_flags: <defaults>
</compile_context>

<pallas_src>
import jax
import jax.numpy as jnp
from jax.experimental import pallas as pl
from jax.experimental.pallas import tpu as pltpu


_VMEM_TABLE_LIMIT_BYTES = 12 * 1024 * 1024   # fast-path threshold (fits v7x budget)


def _make_vmem_gather_kernel(rows_per_step):
    """Gather rows from an in-VMEM table with dynamic sublane reads."""
    G = rows_per_step

    def kernel(rows_ref, q_ref, o_ref):
        # rows_ref : SMEM int32[n_steps*G]  flat gather row indices
        # q_ref    : VMEM f32[T*V, V]       whole table, grid-invariant (DMA'd once)
        # o_ref    : VMEM f32[G, V]         current dense output tile
        base = pl.program_id(0) * G
        for g in range(G):
            r = rows_ref[base + g]
            o_ref[pl.ds(g, 1), :] = q_ref[pl.ds(r, 1), :]

    return kernel


def _make_dma_gather_kernel(rows_per_step):
    """Gather rows from an HBM table with per-row async DMAs into the output tile."""
    G = rows_per_step

    def kernel(rows_ref, q_hbm, o_ref, sems):
        # rows_ref : SMEM int32[n_steps*G]  flat gather row indices
        # q_hbm    : HBM  f32[T*V, V]       raw ref, manual DMA gather
        # o_ref    : VMEM f32[G, V]         DMA destination == output tile
        # sems     : DMA semaphores [G]
        base = pl.program_id(0) * G
        copies = []
        # Read all SMEM indices and issue every DMA before the first wait
        # (waits break SMEM sst->sld forwarding; many reads in flight hide the
        # HBM random-access latency).  Destination is the output tile itself,
        # so there is no VMEM->VMEM copy before writeback.
        for g in range(G):
            r = rows_ref[base + g]
            cp = pltpu.make_async_copy(
                q_hbm.at[pl.ds(r, 1), :],
                o_ref.at[pl.ds(g, 1), :],
                sems.at[g],
            )
            cp.start()
            copies.append(cp)
        for cp in copies:
            cp.wait()

    return kernel


def _pick_rows_per_step(n_rows, requested):
    if requested is not None:
        return int(requested)
    divisors = [g for g in (128, 64, 32, 16, 8) if n_rows % g == 0]
    if divisors:
        for g in divisors:            # descending: prefer the largest G ...
            if n_rows // g >= 4:      # ... that still keeps >=4 grid steps (v7x 2-TC split)
                return g
        return divisors[-1]           # tiny problem: favor more grid steps
    return 8                          # ragged: tail is padded + sliced (rare)


def q_star_gather(q_star, target_text_ids, *, rows_per_step=None,
                  force_dma_gather=False):
    """logits[b, t, :] = q_star[t, target_text_ids[b, t+1], :] via Pallas gather."""
    T, V, V2 = q_star.shape
    assert V == V2
    B, Tp1 = target_text_ids.shape
    assert Tp1 == T + 1

    n_rows = B * T
    G = _pick_rows_per_step(n_rows, rows_per_step)
    n_steps = pl.cdiv(n_rows, G)
    n_pad = n_steps * G

    # Flat row index into Q2 = [T*V, V]:  row(b, t) = t*V + ids[b, t+1].
    # Clamp ids for bounds safety (an OOB id would otherwise read the wrong
    # timestep's block or DMA out of bounds).
    ids = jnp.clip(target_text_ids[:, 1:].astype(jnp.int32), 0, V - 1)    # [B, T]
    flat_rows = (jnp.arange(T, dtype=jnp.int32)[None, :] * V + ids).reshape(-1)
    if n_pad != n_rows:
        # TODO(synk): handle ragged tails in-kernel instead of pad + slice.
        flat_rows = jnp.concatenate(
            [flat_rows, jnp.zeros((n_pad - n_rows,), jnp.int32)])

    q2 = q_star.reshape(T * V, V)                                          # glue reshape
    itemsize = jnp.dtype(q_star.dtype).itemsize
    cost = pl.CostEstimate(flops=0, transcendentals=0,
                           bytes_accessed=2 * n_rows * V * itemsize)
    out_spec = pl.BlockSpec((G, V), lambda s, rows: (s, 0))

    use_vmem_path = (not force_dma_gather
                     and q2.size * itemsize <= _VMEM_TABLE_LIMIT_BYTES)

    if use_vmem_path:
        out2 = pl.pallas_call(
            _make_vmem_gather_kernel(G),
            out_shape=jax.ShapeDtypeStruct((n_pad, V), q_star.dtype),
            grid_spec=pltpu.PrefetchScalarGridSpec(
                num_scalar_prefetch=1,                   # flat_rows -> SMEM
                grid=(n_steps,),
                in_specs=[pl.BlockSpec((T * V, V), lambda s, rows: (0, 0))],
                out_specs=out_spec,
            ),
            compiler_params=pltpu.CompilerParams(
                dimension_semantics=("parallel",),
                vmem_limit_bytes=32 * 1024 * 1024),
            cost_estimate=cost,
        )(flat_rows, q2)
    else:
        out2 = pl.pallas_call(
            _make_dma_gather_kernel(G),
            out_shape=jax.ShapeDtypeStruct((n_pad, V), q_star.dtype),
            grid_spec=pltpu.PrefetchScalarGridSpec(
                num_scalar_prefetch=1,                   # flat_rows -> SMEM
                grid=(n_steps,),
                in_specs=[pl.BlockSpec(memory_space=pl.ANY)],   # table stays in HBM
                out_specs=out_spec,
                scratch_shapes=[pltpu.SemaphoreType.DMA((G,))],
            ),
            compiler_params=pltpu.CompilerParams(
                dimension_semantics=("parallel",)),
            cost_estimate=cost,
        )(flat_rows, q2)

    if n_pad != n_rows:
        out2 = out2[:n_rows]
    return out2.reshape(B, T, V)


class Seq2SeqAttnTarget3:
    """JAX/Pallas re-implementation of the PyTorch Seq2SeqAttnTarget3 module."""

    def __init__(self, reward_shaping, reward_shaping_min, reward_shaping_max,
                 *, num_steps, vocab_size, key):
        if any([reward_shaping is False,
                reward_shaping_min != -5,
                reward_shaping_max != 5]):
            raise ValueError('Reward shaping config is not supported')
        # TODO(synk): original module torch.load's a pretrained Q_star_list .pth;
        # replaced with a deterministic synthetic [T, V, V] table.
        self._Q_star = jax.random.normal(
            key, (num_steps, vocab_size, vocab_size), dtype=jnp.float32)

    def __call__(self, batch, mode="train"):
        ids = batch["target_text_ids"].astype(jnp.int32)
        logits = q_star_gather(self._Q_star, ids)
        # AttentionRNNDecoderOutput3(logits=...) modeled as a dict.
        return {"logits": logits}, batch["target_length"] - 1


if __name__ == "__main__":
    # Small but layout-friendly shapes: vocab at the 128-lane width so the
    # (G, V) output tiles are fully sublane/lane dense.
    B, T, V = 4, 8, 128

    key = jax.random.PRNGKey(0)
    k_q, k_ids = jax.random.split(key)

    target_text_ids = jax.random.randint(
        k_ids, (B, T + 1), 0, V, dtype=jnp.int32)       # includes BOS column
    target_length = jnp.full((B,), T + 1, dtype=jnp.int32)

    model = Seq2SeqAttnTarget3(
        reward_shaping=True, reward_shaping_min=-5, reward_shaping_max=5,
        num_steps=T, vocab_size=V, key=k_q)

    batch = {"target_text_ids": target_text_ids, "target_length": target_length}
    out, lens_minus_one = model(batch, mode="train")
    logits = jax.block_until_ready(out["logits"])
    lens_minus_one = jax.block_until_ready(lens_minus_one)

    # Pure-JAX reference of the gather semantics.
    ref = model._Q_star[jnp.arange(T)[None, :], target_text_ids[:, 1:], :]
    assert logits.shape == (B, T, V)
    assert jnp.array_equal(logits, ref), "Pallas VMEM gather mismatch vs reference"
    assert jnp.array_equal(lens_minus_one, target_length - 1)

    # Also exercise the large-table (HBM DMA-gather) path explicitly.
    logits_dma = jax.block_until_ready(
        q_star_gather(model._Q_star, target_text_ids, force_dma_gather=True))
    assert jnp.array_equal(logits_dma, ref), "Pallas DMA gather mismatch vs reference"

    print("KERNEL_OK")
</pallas_src>

<mosaic_0001>
module attributes {stable_mosaic.version = 11 : i64} {
  func.func @kernel(%arg0: i32, %arg1: memref<32xi32, #tpu.memory_space<smem>>, %arg2: memref<1024x128xf32, #tpu.memory_space<vmem>>, %arg3: memref<8x128xf32, #tpu.memory_space<vmem>>) attributes {dimension_semantics = [#tpu.dimension_semantics<parallel>], iteration_bounds = array<i64: 4>, scalar_prefetch = 1 : i64, scratch_operands = 0 : i64, tpu.core_type = #tpu.core_type<tc>, window_params = [{pipeline_mode = #tpu.pipeline_mode<synchronous>, transform_indices = @transform_0, window_bounds = array<i64: 1024, 128>}, {transform_indices = @transform_1, window_bounds = array<i64: 8, 128>}]} {
    %c8_i32 = arith.constant 8 : i32
    %0 = arith.muli %arg0, %c8_i32 : i32
    %c0_i32 = arith.constant 0 : i32
    %1 = arith.addi %0, %c0_i32 : i32
    %2 = arith.index_cast %1 : i32 to index
    %3 = memref.load %arg1[%2] : memref<32xi32, #tpu.memory_space<smem>>
    %4 = arith.index_cast %3 : i32 to index
    %c0 = arith.constant 0 : index
    %5 = vector.load %arg2[%4, %c0] : memref<1024x128xf32, #tpu.memory_space<vmem>>, vector<1x128xf32>
    %c0_0 = arith.constant 0 : index
    %c0_1 = arith.constant 0 : index
    %6 = vector.load %arg3[%c0_0, %c0_1] : memref<8x128xf32, #tpu.memory_space<vmem>>, vector<1x128xf32>
    tpu.vector_store %arg3[%c0_0, %c0_1], %5 {strides = array<i32>} : memref<8x128xf32, #tpu.memory_space<vmem>>, vector<1x128xf32>,
    %c1_i32 = arith.constant 1 : i32
    %7 = arith.addi %0, %c1_i32 : i32
    %8 = arith.index_cast %7 : i32 to index
    %9 = memref.load %arg1[%8] : memref<32xi32, #tpu.memory_space<smem>>
    %10 = arith.index_cast %9 : i32 to index
    %c0_2 = arith.constant 0 : index
    %11 = vector.load %arg2[%10, %c0_2] : memref<1024x128xf32, #tpu.memory_space<vmem>>, vector<1x128xf32>
    %c1 = arith.constant 1 : index
    %c0_3 = arith.constant 0 : index
    %12 = vector.load %arg3[%c1, %c0_3] : memref<8x128xf32, #tpu.memory_space<vmem>>, vector<1x128xf32>
    tpu.vector_store %arg3[%c1, %c0_3], %11 {strides = array<i32>} : memref<8x128xf32, #tpu.memory_space<vmem>>, vector<1x128xf32>,
    %c2_i32 = arith.constant 2 : i32
    %13 = arith.addi %0, %c2_i32 : i32
    %14 = arith.index_cast %13 : i32 to index
    %15 = memref.load %arg1[%14] : memref<32xi32, #tpu.memory_space<smem>>
    %16 = arith.index_cast %15 : i32 to index
    %c0_4 = arith.constant 0 : index
    %17 = vector.load %arg2[%16, %c0_4] : memref<1024x128xf32, #tpu.memory_space<vmem>>, vector<1x128xf32>
    %c2 = arith.constant 2 : index
    %c0_5 = arith.constant 0 : index
    %18 = vector.load %arg3[%c2, %c0_5] : memref<8x128xf32, #tpu.memory_space<vmem>>, vector<1x128xf32>
    tpu.vector_store %arg3[%c2, %c0_5], %17 {strides = array<i32>} : memref<8x128xf32, #tpu.memory_space<vmem>>, vector<1x128xf32>,
    %c3_i32 = arith.constant 3 : i32
    %19 = arith.addi %0, %c3_i32 : i32
    %20 = arith.index_cast %19 : i32 to index
    %21 = memref.load %arg1[%20] : memref<32xi32, #tpu.memory_space<smem>>
    %22 = arith.index_cast %21 : i32 to index
    %c0_6 = arith.constant 0 : index
    %23 = vector.load %arg2[%22, %c0_6] : memref<1024x128xf32, #tpu.memory_space<vmem>>, vector<1x128xf32>
    %c3 = arith.constant 3 : index
    %c0_7 = arith.constant 0 : index
    %24 = vector.load %arg3[%c3, %c0_7] : memref<8x128xf32, #tpu.memory_space<vmem>>, vector<1x128xf32>
    tpu.vector_store %arg3[%c3, %c0_7], %23 {strides = array<i32>} : memref<8x128xf32, #tpu.memory_space<vmem>>, vector<1x128xf32>,
    %c4_i32 = arith.constant 4 : i32
    %25 = arith.addi %0, %c4_i32 : i32
    %26 = arith.index_cast %25 : i32 to index
    %27 = memref.load %arg1[%26] : memref<32xi32, #tpu.memory_space<smem>>
    %28 = arith.index_cast %27 : i32 to index
    %c0_8 = arith.constant 0 : index
    %29 = vector.load %arg2[%28, %c0_8] : memref<1024x128xf32, #tpu.memory_space<vmem>>, vector<1x128xf32>
    %c4 = arith.constant 4 : index
    %c0_9 = arith.constant 0 : index
    %30 = vector.load %arg3[%c4, %c0_9] : memref<8x128xf32, #tpu.memory_space<vmem>>, vector<1x128xf32>
    tpu.vector_store %arg3[%c4, %c0_9], %29 {strides = array<i32>} : memref<8x128xf32, #tpu.memory_space<vmem>>, vector<1x128xf32>,
    %c5_i32 = arith.constant 5 : i32
    %31 = arith.addi %0, %c5_i32 : i32
    %32 = arith.index_cast %31 : i32 to index
    %33 = memref.load %arg1[%32] : memref<32xi32, #tpu.memory_space<smem>>
    %34 = arith.index_cast %33 : i32 to index
    %c0_10 = arith.constant 0 : index
    %35 = vector.load %arg2[%34, %c0_10] : memref<1024x128xf32, #tpu.memory_space<vmem>>, vector<1x128xf32>
    %c5 = arith.constant 5 : index
    %c0_11 = arith.constant 0 : index
    %36 = vector.load %arg3[%c5, %c0_11] : memref<8x128xf32, #tpu.memory_space<vmem>>, vector<1x128xf32>
    tpu.vector_store %arg3[%c5, %c0_11], %35 {strides = array<i32>} : memref<8x128xf32, #tpu.memory_space<vmem>>, vector<1x128xf32>,
    %c6_i32 = arith.constant 6 : i32
    %37 = arith.addi %0, %c6_i32 : i32
    %38 = arith.index_cast %37 : i32 to index
    %39 = memref.load %arg1[%38] : memref<32xi32, #tpu.memory_space<smem>>
    %40 = arith.index_cast %39 : i32 to index
    %c0_12 = arith.constant 0 : index
    %41 = vector.load %arg2[%40, %c0_12] : memref<1024x128xf32, #tpu.memory_space<vmem>>, vector<1x128xf32>
    %c6 = arith.constant 6 : index
    %c0_13 = arith.constant 0 : index
    %42 = vector.load %arg3[%c6, %c0_13] : memref<8x128xf32, #tpu.memory_space<vmem>>, vector<1x128xf32>
    tpu.vector_store %arg3[%c6, %c0_13], %41 {strides = array<i32>} : memref<8x128xf32, #tpu.memory_space<vmem>>, vector<1x128xf32>,
    %c7_i32 = arith.constant 7 : i32
    %43 = arith.addi %0, %c7_i32 : i32
    %44 = arith.index_cast %43 : i32 to index
    %45 = memref.load %arg1[%44] : memref<32xi32, #tpu.memory_space<smem>>
    %46 = arith.index_cast %45 : i32 to index
    %c0_14 = arith.constant 0 : index
    %47 = vector.load %arg2[%46, %c0_14] : memref<1024x128xf32, #tpu.memory_space<vmem>>, vector<1x128xf32>
    %c7 = arith.constant 7 : index
    %c0_15 = arith.constant 0 : index
    %48 = vector.load %arg3[%c7, %c0_15] : memref<8x128xf32, #tpu.memory_space<vmem>>, vector<1x128xf32>
    tpu.vector_store %arg3[%c7, %c0_15], %47 {strides = array<i32>} : memref<8x128xf32, #tpu.memory_space<vmem>>, vector<1x128xf32>,
    return
  }
  func.func @transform_0(%arg0: i32, %arg1: memref<32xi32, #tpu.memory_space<smem>>) -> (i32, i32) {
    %c0_i32 = arith.constant 0 : i32
    %c0_i32_0 = arith.constant 0 : i32
    %c0_i32_1 = arith.constant 0 : i32
    return %c0_i32, %c0_i32_0 : i32, i32
  }
  func.func @transform_1(%arg0: i32, %arg1: memref<32xi32, #tpu.memory_space<smem>>) -> (i32, i32) {
    %c0_i32 = arith.constant 0 : i32
    %c0_i32_0 = arith.constant 0 : i32
    return %arg0, %c0_i32 : i32, i32
  }
}

</mosaic_0001>

<bundles_post_ra>
// kernel: tpu_custom_call.1
= control target key start
LH: loop header
LB: loop body
LE: loop exit
PB: predicated region body
PF: predicated region fallthrough
CT: control target
= control target key end

     0   :  { %s420_s12 = smov [#allocation3]   ;;  %s558_s0 = inlined_call_operand.hbm [shape: s32[32], index: 0, kind: input, shape index: {}]   ;;  %s559_s1 = inlined_call_operand.hbm [shape: f32[1024,128], index: 1, kind: input, shape index: {}]   ;;  %s560_s2 = inlined_call_operand.hbm [shape: f32[32,128], index: 2, kind: output, shape index: {}]  }
   0x1   :  { %s8_s11 = sshll.u32 %s558_s0, 4  ;;  %s9_s11 = int_to_ptr.hbm [resolvable:$true] %s8_s11 }
   0x2   :  { %11 = dma.hbm_to_smem %s9_s11, 16, %s420_s12, [#allocation2] }
   0x3   :  { %394 = dma.done.wait [#allocation2], 16 }
   0x4   :  { %395 = vsyncadd [#allocation2], 4294967280 }
   0x5   :  { %14 = sfence }
   0x6   :  { %15 = vsyncpa [#allocation5], 0 }
   0x7   :  { %16 = vsyncpa [#allocation6], 0 }
   0x8   :  { %18 = vsyncpa [#allocation6 + $0x1], 0  ;;  %s442_s13 = smov 0   ;;  %s444_s14 = smov 0  }
   0x9   :  { %s446_s15 = smov 0   ;;  %s448_s16 = smov 0  }
   0xa LB: > { %s463_s0 = sadd.s32 4294967295, %s418_s16   ;;  %s244_s17 = sadd.s32 4294967294, %s418_s16   ;;  %s418_s16 = sphi %s448_s16, %s566_s16   ;;  %s414_s15 = sphi %s446_s15, %s565_s15   ;;  %s410_s14 = sphi %s444_s14, %s564_s14   ;;  %s406_s13 = sphi %s442_s13, %s563_s13  }
   0xb   : > { %s467_s18 = sadd.s32 1, %s418_s16   ;;  %s52_s19 = sadd.s32 1, %s414_s15 }
   0xc   : > { %s49_s20 = ssub.s32 %s418_s16, %s467_s18  ;;  %p62_p0 = scmp.ne.s32.totalorder %s414_s15, %s410_s14 }
   0xd   : > { %p50_p1 = scmp.eq.s32.totalorder %s49_s20, 0  ;;  %p63_p2 = scmp.eq.s32.totalorder %s463_s0, 3 }
   0xe   : > { %p68_p3 = scmp.ne.s32.totalorder %s410_s14, %s406_s13  ;;  %p69_p4 = scmp.eq.s32.totalorder %s244_s17, 3 }
   0xf   : > { %s478_s21 = scalar_select %p50_p1, %s414_s15, %s52_s19  }
  0x10   : > { %p480_p5 = por %p63_p2, %p62_p0  ;;  %p484_p6 = por %p69_p4, %p68_p3 }
  0x11   : > { %p245_p7 = scmp.ge.s32.totalorder %s418_s16, 1  ;;  %p76_p8 = scmp.lt.s32.totalorder %s418_s16, 5 }
  0x12   : > { %p269_p9 = scmp.eq.s32.totalorder %s463_s0, 0  ;;  %s87_s26 = sshll.u32 %s559_s1, 4  ;;  %s88_s26 = int_to_ptr.hbm [resolvable:$true] %s87_s26 }
  0x13   : > { %p77_p10 = pnand %p245_p7, %p76_p8  ;;  %s421_s27 = smov [#allocation4]  }
  0x14   : > { %s89_s28 = sshll.u32 %s421_s27, 4  ;;  %s422_s29 = smov 128   ;;  %s90_s28 = int_to_ptr.vmem [resolvable:$true] %s89_s28 }
  0x15   : > { %p261_p11 = pneg %p77_p10  ;;  %s423_s30 = smov 8  }
  0x16   : > { %105 = sbr.rel (%p77_p10) target bundleno = 55 (0x37), region = 24 }
  0x17   : > { %p262_p12 = pnand %p269_p9, %p261_p11 }
  0x19   : > { %264 = dma.hbm_to_vmem [thread:$0]  (!%p262_p12), %s88_s26, 16384, %s90_s28, [#allocation5], %s422_s29, %s422_s29, %s423_s30  }
  0x1b   : > { %397 = dma.done.wait (%p269_p9), [#allocation5], 16384  }
  0x1c   : > { %399 = vsyncadd (%p269_p9), [#allocation5], 4294950912  ;;  %s118_s3 = sand.u32 1, %s410_s14   ;;  %s502_s4 = sshll.u32 %s463_s0, 3 }
  0x1d   : > { %s249_s5 = sshll.u32 %s118_s3, 3  ;;  %s122_s6 = sld [smem:[#allocation3 + %s502_s4]] }
  0x1e   : > { %s126_s7 = sadd.s32 1, %s502_s4  ;;  %s131_s8 = sadd.s32 2, %s502_s4 }
  0x1f   : > { %s127_s9 = sld [smem:[#allocation3 + %s126_s7]]  ;;  %s136_s10 = sadd.s32 3, %s502_s4 }
  0x20   : > { %s132_s11 = sld [smem:[#allocation3 + %s131_s8]]  ;;  %s141_s12 = sadd.s32 4, %s502_s4 }
  0x21   : > { %s137_s0 = sld [smem:[#allocation3 + %s136_s10]]  ;;  %s146_s17 = sadd.s32 5, %s502_s4 }
  0x22   : > { %s142_s19 = sld [smem:[#allocation3 + %s141_s12]]  ;;  %s151_s25 = sadd.s32 6, %s502_s4 }
  0x23   : > { %s123_s20 = scalar_lea.vmem [#allocation4], %s122_s6  ;;  %s147_s24 = sld [smem:[#allocation3 + %s146_s17]] }
  0x24   : > { %v124_v0 = vld [vmem:[%s123_s20] sm:$0x1]  ;;  %s513_s26 = scalar_lea.vmem [#allocation7], %s249_s5  ;;  %s152_s27 = sld [smem:[#allocation3 + %s151_s25]] }
  0x25   : > { %125 = vst [vmem:[%s513_s26] sm:$0x1] %v124_v0  ;;  %s156_s28 = sadd.s32 7, %s502_s4  ;;  %s128_s30 = scalar_lea.vmem [#allocation4], %s127_s9 }
  0x26   : > { %s157_s29 = sld [smem:[#allocation3 + %s156_s28]]  ;;  %v129_v1 = vld [vmem:[%s128_s30] sm:$0x1]  ;;  %s172_s6 = scalar_lea.hbm %s560_s2, %s502_s4 }
  0x27   : > { %130 = vst [vmem:[%s513_s26 + $0x1] sm:$0x1] %v129_v1  ;;  %s133_s5 = scalar_lea.vmem [#allocation4], %s132_s11  ;;  %s174_s10 = sshll.u32 %s513_s26, 4  ;;  %s175_s10 = int_to_ptr.vmem [resolvable:$true] %s174_s10 }
  0x28   : > { %v134_v2 = vld [vmem:[%s133_s5] sm:$0x1]  ;;  %s138_s12 = scalar_lea.vmem [#allocation4], %s137_s0  ;;  %s143_s17 = scalar_lea.vmem [#allocation4], %s142_s19 }
  0x29   : > { %135 = vst [vmem:[%s513_s26 + $0x2] sm:$0x1] %v134_v2  ;;  %v139_v3 = vld [vmem:[%s138_s12] sm:$0x1]  ;;  %s176_s9 = sshll.u32 %s172_s6, 4  ;;  %s148_s20 = scalar_lea.vmem [#allocation4], %s147_s24  ;;  %s177_s9 = int_to_ptr.hbm [resolvable:$true] %s176_s9 }
  0x2a   : > { %140 = vst [vmem:[%s513_s26 + $0x3] sm:$0x1] %v139_v3  ;;  %v144_v4 = vld [vmem:[%s143_s17] sm:$0x1]  ;;  %s153_s4 = scalar_lea.vmem [#allocation4], %s152_s27  ;;  %s162_s0 = scalar_lea.sflag [#allocation6], %s118_s3 }
  0x2b   : > { %145 = vst [vmem:[%s513_s26 + $0x4] sm:$0x1] %v144_v4  ;;  %v149_v5 = vld [vmem:[%s148_s20] sm:$0x1]  ;;  %s364_s25 = sshra.s32 %s177_s9, 4  ;;  %s370_s30 = scalar_lea.hbm %s560_s2, 32  ;;  %s365_s25 = int_to_ptr.hbm [resolvable:$true] %s364_s25 }
  0x2c   : > { %150 = vst [vmem:[%s513_s26 + $0x5] sm:$0x1] %v149_v5  ;;  %v154_v6 = vld [vmem:[%s153_s4] sm:$0x1]  ;;  %s158_s11 = scalar_lea.vmem [#allocation4], %s157_s29  ;;  %s366_s19 = scalar_lea.hbm %s365_s25, 8 }
  0x2d   : > { %155 = vst [vmem:[%s513_s26 + $0x6] sm:$0x1] %v154_v6  ;;  %v159_v7 = vld [vmem:[%s158_s11] sm:$0x1]  ;;  %p367_p13 = scmp.ne.s32.totalorder %s365_s25, %s366_s19  ;;  %p371_p2 = scmp.lt.s32.totalorder %s365_s25, %s560_s2 }
  0x2e   : > { %160 = vst [vmem:[%s513_s26 + $0x7] sm:$0x1] %v159_v7  ;;  %p372_p3 = scmp.lt.s32.totalorder %s370_s30, %s366_s19 }
  0x2f   : > { %p368_p0 = pnand %p367_p13, %p480_p5 }
  0x30   : > { %p373_p4 = por %p372_p3, %p371_p2 }
  0x31   : > { %p369_p1 = pneg %p368_p0 }
  0x33   : > { %p374_p7 = pnand %p373_p4, %p369_p1 }
  0x35   : > { %377 = shalt.err (!%p374_p7)
}
  0x36   : > { %259 = dma.vmem_to_hbm [thread:$0]  (%p480_p5), %s175_s10, 128, %s177_s9, %s162_s0  }
  0x37 PF: > { %p271_p8 = scmp.ge.s32.totalorder %s418_s16, 2  ;;  %s188_s3 = sand.u32 1, %s406_s13  }
  0x38   : > { %s189_s26 = scalar_lea.sflag [#allocation6], %s188_s3 }
  0x39   : > { %p266_p9 = pnand %p271_p8, %p484_p6 }
  0x3b   : > { %p267_p10 = pneg %p266_p9 }
  0x3d   : > { %401 = dma.done.wait (%p267_p10), %s189_s26, 128  }
  0x3e   : > { %403 = vsyncadd (%p267_p10), %s189_s26, 4294967168  ;;  %p21_p11 = scmp.ge.s32.totalorder %s467_s18, 6   ;;  %s563_s13 = smov %s410_s14 }
  0x3f   : > { %s564_s14 = smov %s414_s15  ;;  %s565_s15 = smov %s478_s21 }
  0x40   : > { %s566_s16 = smov %s467_s18  ;;  %23 = sbr.rel (!%p21_p11) target bundleno = 10 (0xa), region = 69 }
  0x45   :  { %195 = vsyncpa [#allocation5], 1 }
  0x46   :  { %197 = vsyncpa [#allocation5 + $0x1], 1 }
  0x47   :  { %198 = vsyncpa [#allocation6], 1 }
  0x48   :  { %200 = vsyncpa [#allocation6 + $0x1], 1 }

</bundles_post_ra>
